<compile_context>
chip_gen: v5e
topology: v5e:2x2
jax: 0.10.0
libtpu: 0.0.40
codegen_flags: <defaults>
</compile_context>

<pallas_src>
import functools

import jax
import jax.numpy as jnp
from jax.experimental import pallas as pl
from jax.experimental.pallas import tpu as pltpu

_VMEM_LIMIT = 48 * 1024 * 1024         # <= physical VMEM on v5e/v6e/v7x
_FUSED_MAX_BYTES = 4 * 1024 * 1024     # M <= 4 MiB -> single fused kernel
_TILE_TARGET_BYTES = 4 * 1024 * 1024   # ~4 MiB M row-tiles on the tiled path


def _round_up(x, m):
    return ((x + m - 1) // m) * m


def _choose_tile_rows(ns, nt):
    """Row-tile size (multiple of 8, ~4 MiB f32 tile)."""
    # TODO(synk): extremely wide problems (Nt > ~250k) would need column
    # tiling as well; row tiles alone may exceed the VMEM budget there.
    bytes_per_row = nt * 4
    t = max(8, (_TILE_TARGET_BYTES // max(bytes_per_row, 1)) // 8 * 8)
    return min(t, _round_up(ns, 8))


# --------------------------------------------------------------------------
# Fused fast path: whole problem resident in VMEM, one kernel, 2 HBM passes.
# --------------------------------------------------------------------------
def _ot_fused_kernel(inv_reg_ref, beta_ref, v_ref, m_ref, pi_ref):
    inv_reg = inv_reg_ref[0]
    r = v_ref[...] - m_ref[...]                                # (Ns, Nt)
    max_r = jnp.max(r, axis=1, keepdims=True)                  # (Ns, 1)
    t = (r - max_r) * inv_reg                                  # (Ns, Nt)
    s = jnp.sum(jnp.exp(t) * beta_ref[...], axis=1, keepdims=True)
    e = t - jnp.log(s)                                         # log-domain exponent
    cmax = jnp.max(e, axis=0, keepdims=True)                   # (1, Nt)
    pi_ref[...] = jnp.exp(e - cmax)


# --------------------------------------------------------------------------
# Tiled path, kernel 1: per-row stats + per-tile column max of the exponent.
# --------------------------------------------------------------------------
def _ot_rowstats_colmax_kernel(inv_reg_ref, beta_ref, v_ref, m_ref,
                               c_ref, colmax_ref,
                               *, tile_rows, n_valid_rows, needs_row_mask):
    i = pl.program_id(0)
    inv_reg = inv_reg_ref[0]

    r = v_ref[...] - m_ref[...]                                # (T, Nt)
    max_r = jnp.max(r, axis=1, keepdims=True)                  # (T, 1)
    t = (r - max_r) * inv_reg
    s = jnp.sum(jnp.exp(t) * beta_ref[...], axis=1, keepdims=True)
    log_s = jnp.log(s)

    # Per-row stat so kernel 2 can rebuild e without the exp/rowsum:
    #   e_ij = (v_j - M_ij) * inv_reg - c_i
    c_ref[...] = max_r * inv_reg + log_s                       # (T, 1)

    e = t - log_s                                              # (T, Nt)
    if needs_row_mask:
        # Only the last (partial) tile can contain out-of-bounds garbage rows;
        # keep them out of the column max.
        row_id = (jax.lax.broadcasted_iota(jnp.int32, (tile_rows, 1), 0)
                  + i * tile_rows)
        e = jnp.where(row_id < n_valid_rows, e, -jnp.inf)

    cmax = jnp.max(e, axis=0, keepdims=True)                   # (1, Nt)
    colmax_ref[...] = cmax[None]                               # (1, 1, Nt)


# --------------------------------------------------------------------------
# Tiled path, kernel 2: recompute exponent from per-row stat, write pi.
# --------------------------------------------------------------------------
def _ot_pi_kernel(inv_reg_ref, v_ref, colmax_ref, c_ref, m_ref, pi_ref):
    inv_reg = inv_reg_ref[0]
    e = (v_ref[...] - m_ref[...]) * inv_reg - c_ref[...]       # (T, Nt)
    pi_ref[...] = jnp.exp(e - colmax_ref[...])


@functools.partial(jax.jit, static_argnames=("force_tile_rows",))
def ot_forward(beta, M, reg, cur_v, force_tile_rows=None):
    """Pallas equivalent of otsolver.forward(beta, M, reg, cur_v) -> pi.

    beta : [Nt] f32, M : [Ns, Nt] f32, reg : scalar, cur_v : [Nt] f32
    returns pi : [Ns, Nt] f32
    """
    Ns, Nt = M.shape
    M_f = M.astype(jnp.float32)
    beta_r = beta.astype(jnp.float32).reshape(1, Nt)
    v_r = cur_v.astype(jnp.float32).reshape(1, Nt)
    inv_reg = (1.0 / jnp.asarray(reg, jnp.float32)).reshape(1)

    m_bytes = Ns * Nt * 4
    use_fused = force_tile_rows is None and m_bytes <= _FUSED_MAX_BYTES

    if use_fused:
        # Single kernel, full-dim blocks (no padding), output at true shape.
        return pl.pallas_call(
            _ot_fused_kernel,
            grid_spec=pltpu.PrefetchScalarGridSpec(
                num_scalar_prefetch=1,
                grid=(1,),
                in_specs=[
                    pl.BlockSpec((1, Nt), lambda i, s: (0, 0)),    # beta
                    pl.BlockSpec((1, Nt), lambda i, s: (0, 0)),    # v
                    pl.BlockSpec((Ns, Nt), lambda i, s: (0, 0)),   # M
                ],
                out_specs=pl.BlockSpec((Ns, Nt), lambda i, s: (0, 0)),
            ),
            out_shape=jax.ShapeDtypeStruct((Ns, Nt), jnp.float32),
            compiler_params=pltpu.CompilerParams(
                dimension_semantics=("arbitrary",),
                vmem_limit_bytes=_VMEM_LIMIT,
            ),
        )(inv_reg, beta_r, v_r, M_f)

    # ---------------- tiled (large-problem) path ----------------
    T = int(force_tile_rows) if force_tile_rows is not None else \
        _choose_tile_rows(Ns, Nt)
    num_tiles = (Ns + T - 1) // T
    needs_row_mask = (num_tiles * T != Ns)

    kernel1 = functools.partial(
        _ot_rowstats_colmax_kernel,
        tile_rows=T, n_valid_rows=Ns, needs_row_mask=needs_row_mask)

    c, colmax_tiles = pl.pallas_call(
        kernel1,
        grid_spec=pltpu.PrefetchScalarGridSpec(
            num_scalar_prefetch=1,
            grid=(num_tiles,),
            in_specs=[
                pl.BlockSpec((1, Nt), lambda i, s: (0, 0)),        # beta
                pl.BlockSpec((1, Nt), lambda i, s: (0, 0)),        # v
                pl.BlockSpec((T, Nt), lambda i, s: (i, 0)),        # M row tile
            ],
            out_specs=[
                pl.BlockSpec((T, 1), lambda i, s: (i, 0)),         # per-row c
                pl.BlockSpec((1, 1, Nt), lambda i, s: (i, 0, 0)),  # per-tile colmax
            ],
        ),
        out_shape=(
            jax.ShapeDtypeStruct((Ns, 1), jnp.float32),
            jax.ShapeDtypeStruct((num_tiles, 1, Nt), jnp.float32),
        ),
        compiler_params=pltpu.CompilerParams(
            dimension_semantics=("parallel",),
            vmem_limit_bytes=_VMEM_LIMIT,
        ),
    )(inv_reg, beta_r, v_r, M_f)

    # Tiny (num_tiles, 1, Nt) -> (1, Nt) reduction, hoisted out of the kernel.
    colmax = jnp.max(colmax_tiles, axis=0)

    pi = pl.pallas_call(
        _ot_pi_kernel,
        grid_spec=pltpu.PrefetchScalarGridSpec(
            num_scalar_prefetch=1,
            grid=(num_tiles,),
            in_specs=[
                pl.BlockSpec((1, Nt), lambda i, s: (0, 0)),        # v
                pl.BlockSpec((1, Nt), lambda i, s: (0, 0)),        # colmax
                pl.BlockSpec((T, 1), lambda i, s: (i, 0)),         # per-row c
                pl.BlockSpec((T, Nt), lambda i, s: (i, 0)),        # M row tile
            ],
            out_specs=pl.BlockSpec((T, Nt), lambda i, s: (i, 0)),  # pi, true shape
        ),
        out_shape=jax.ShapeDtypeStruct((Ns, Nt), jnp.float32),
        compiler_params=pltpu.CompilerParams(
            dimension_semantics=("parallel",),
            vmem_limit_bytes=_VMEM_LIMIT,
        ),
    )(inv_reg, v_r, colmax, c, M_f)

    return pi


def ot_forward_ref(beta, M, reg, cur_v):
    """Pure-JAX reference mirroring the PyTorch forward, for verification."""
    r = cur_v[None, :] - M
    max_r = jnp.max(r, axis=1, keepdims=True)
    exp_beta = jnp.exp((r - max_r) / reg) * beta[None, :]
    u = (-max_r - reg * jnp.log(jnp.sum(exp_beta, axis=1, keepdims=True))
         ).squeeze(-1)
    uv_cross = u[:, None] + cur_v[None, :]
    exponent = (uv_cross - M) / reg
    max_exponent = jnp.max(exponent, axis=0, keepdims=True)
    return jnp.exp(exponent - max_exponent)


if __name__ == "__main__":
    key = jax.random.PRNGKey(0)
    k1, k2, k3, k4, k5, k6 = jax.random.split(key, 6)

    # Case 1: lane-aligned shapes (fused single-kernel path).
    Ns, Nt, reg = 16, 128, 0.5
    beta = jax.random.uniform(k1, (Nt,), dtype=jnp.float32) + 0.1
    beta = beta / jnp.sum(beta)
    M = jnp.abs(jax.random.normal(k2, (Ns, Nt), dtype=jnp.float32))
    cur_v = 0.1 * jax.random.normal(k3, (Nt,), dtype=jnp.float32)

    pi = jax.block_until_ready(ot_forward(beta, M, reg, cur_v))
    pi_ref = ot_forward_ref(beta, M, reg, cur_v)
    assert pi.shape == (Ns, Nt)
    assert jnp.allclose(pi, pi_ref, atol=1e-5, rtol=1e-4), "case1 mismatch"

    # Case 2: ragged shapes (Ns % 8 != 0, Nt % 128 != 0), fused path,
    # exercising full-dim (unpadded) blocks and ragged-lane stores.
    Ns2, Nt2, reg2 = 20, 100, 0.7
    beta2 = jax.random.uniform(k4, (Nt2,), dtype=jnp.float32) + 0.1
    beta2 = beta2 / jnp.sum(beta2)
    M2 = jnp.abs(jax.random.normal(k5, (Ns2, Nt2), dtype=jnp.float32))
    v2 = 0.1 * jax.random.normal(k6, (Nt2,), dtype=jnp.float32)

    pi2 = jax.block_until_ready(ot_forward(beta2, M2, reg2, v2))
    pi2_ref = ot_forward_ref(beta2, M2, reg2, v2)
    assert pi2.shape == (Ns2, Nt2)
    assert jnp.allclose(pi2, pi2_ref, atol=1e-5, rtol=1e-4), "case2 mismatch"

    # Case 3: same ragged inputs, forced through the large-problem tiled path
    # (row tiles of 8, partial last tile + mask, per-tile colmax reduction).
    pi3 = jax.block_until_ready(
        ot_forward(beta2, M2, reg2, v2, force_tile_rows=8))
    assert pi3.shape == (Ns2, Nt2)
    assert jnp.allclose(pi3, pi2_ref, atol=1e-5, rtol=1e-4), "case3 mismatch"

    print("KERNEL_OK")
</pallas_src>

<mosaic_0001>
module attributes {stable_mosaic.version = 11 : i64} {
  func.func @_ot_fused_kernel(%arg0: i32, %arg1: memref<1xf32, #tpu.memory_space<smem>>, %arg2: memref<1x128xf32, #tpu.memory_space<vmem>>, %arg3: memref<1x128xf32, #tpu.memory_space<vmem>>, %arg4: memref<16x128xf32, #tpu.memory_space<vmem>>, %arg5: memref<16x128xf32, #tpu.memory_space<vmem>>) attributes {dimension_semantics = [#tpu.dimension_semantics<arbitrary>], iteration_bounds = array<i64: 1>, scalar_prefetch = 1 : i64, scratch_operands = 0 : i64, tpu.core_type = #tpu.core_type<tc>, window_params = [{pipeline_mode = #tpu.pipeline_mode<synchronous>, transform_indices = @transform_0, window_bounds = array<i64: 1, 128>}, {pipeline_mode = #tpu.pipeline_mode<synchronous>, transform_indices = @transform_1, window_bounds = array<i64: 1, 128>}, {pipeline_mode = #tpu.pipeline_mode<synchronous>, transform_indices = @transform_2, window_bounds = array<i64: 16, 128>}, {pipeline_mode = #tpu.pipeline_mode<synchronous>, transform_indices = @transform_3, window_bounds = array<i64: 16, 128>}]} {
    %c0 = arith.constant 0 : index
    %0 = memref.load %arg1[%c0] : memref<1xf32, #tpu.memory_space<smem>>
    %c0_0 = arith.constant 0 : index
    %c0_1 = arith.constant 0 : index
    %1 = vector.load %arg3[%c0_0, %c0_1] : memref<1x128xf32, #tpu.memory_space<vmem>>, vector<1x128xf32>
    %c0_2 = arith.constant 0 : index
    %c0_3 = arith.constant 0 : index
    %2 = vector.load %arg4[%c0_2, %c0_3] : memref<16x128xf32, #tpu.memory_space<vmem>>, vector<16x128xf32>
    %3 = vector.broadcast %1 : vector<1x128xf32> to vector<16x128xf32>
    %4 = arith.subf %3, %2 : vector<16x128xf32>
    %cst = arith.constant dense<0xFF800000> : vector<16xf32>
    %5 = vector.multi_reduction <maximumf>, %4, %cst [1] : vector<16x128xf32> to vector<16xf32>
    %6 = vector.shape_cast %5 : vector<16xf32> to vector<16x1xf32>
    %7 = vector.broadcast %6 : vector<16x1xf32> to vector<16x128xf32>
    %8 = arith.subf %4, %7 : vector<16x128xf32>
    %9 = vector.broadcast %0 : f32 to vector<16x128xf32>
    %10 = arith.mulf %8, %9 : vector<16x128xf32>
    %11 = math.exp %10 : vector<16x128xf32>
    %c0_4 = arith.constant 0 : index
    %c0_5 = arith.constant 0 : index
    %12 = vector.load %arg2[%c0_4, %c0_5] : memref<1x128xf32, #tpu.memory_space<vmem>>, vector<1x128xf32>
    %13 = vector.broadcast %12 : vector<1x128xf32> to vector<16x128xf32>
    %14 = arith.mulf %11, %13 : vector<16x128xf32>
    %cst_6 = arith.constant dense<0.000000e+00> : vector<16xf32>
    %15 = vector.multi_reduction <add>, %14, %cst_6 [1] : vector<16x128xf32> to vector<16xf32>
    %16 = vector.shape_cast %15 : vector<16xf32> to vector<16x1xf32>
    %17 = math.log %16 : vector<16x1xf32>
    %18 = vector.broadcast %17 : vector<16x1xf32> to vector<16x128xf32>
    %19 = arith.subf %10, %18 : vector<16x128xf32>
    %cst_7 = arith.constant dense<0xFF800000> : vector<128xf32>
    %20 = vector.multi_reduction <maximumf>, %19, %cst_7 [0] : vector<16x128xf32> to vector<128xf32>
    %21 = vector.shape_cast %20 : vector<128xf32> to vector<1x128xf32>
    %22 = vector.broadcast %21 : vector<1x128xf32> to vector<16x128xf32>
    %23 = arith.subf %19, %22 : vector<16x128xf32>
    %24 = math.exp %23 : vector<16x128xf32>
    %c0_8 = arith.constant 0 : index
    %c0_9 = arith.constant 0 : index
    %25 = vector.load %arg5[%c0_8, %c0_9] : memref<16x128xf32, #tpu.memory_space<vmem>>, vector<16x128xf32>
    tpu.vector_store %arg5[%c0_8, %c0_9], %24 {strides = array<i32>} : memref<16x128xf32, #tpu.memory_space<vmem>>, vector<16x128xf32>,
    return
  }
  func.func @transform_0(%arg0: i32, %arg1: memref<1xf32, #tpu.memory_space<smem>>) -> (i32, i32) {
    %c0_i32 = arith.constant 0 : i32
    %c0_i32_0 = arith.constant 0 : i32
    %c0_i32_1 = arith.constant 0 : i32
    return %c0_i32, %c0_i32_0 : i32, i32
  }
  func.func @transform_1(%arg0: i32, %arg1: memref<1xf32, #tpu.memory_space<smem>>) -> (i32, i32) {
    %c0_i32 = arith.constant 0 : i32
    %c0_i32_0 = arith.constant 0 : i32
    %c0_i32_1 = arith.constant 0 : i32
    return %c0_i32, %c0_i32_0 : i32, i32
  }
  func.func @transform_2(%arg0: i32, %arg1: memref<1xf32, #tpu.memory_space<smem>>) -> (i32, i32) {
    %c0_i32 = arith.constant 0 : i32
    %c0_i32_0 = arith.constant 0 : i32
    %c0_i32_1 = arith.constant 0 : i32
    return %c0_i32, %c0_i32_0 : i32, i32
  }
  func.func @transform_3(%arg0: i32, %arg1: memref<1xf32, #tpu.memory_space<smem>>) -> (i32, i32) {
    %c0_i32 = arith.constant 0 : i32
    %c0_i32_0 = arith.constant 0 : i32
    %c0_i32_1 = arith.constant 0 : i32
    return %c0_i32, %c0_i32_0 : i32, i32
  }
}

</mosaic_0001>

<bundles_post_ra>
// kernel: ot_forward.1
= control target key start
LH: loop header
LB: loop body
LE: loop exit
PB: predicated region body
PF: predicated region fallthrough
CT: control target
= control target key end

     0   :  { %10 = vsyncpa [#allocation5], 0  ;;  %s225_s0 = inlined_call_operand.<no memory space> [shape: f32[1], index: 0, kind: input, shape index: {}]   ;;  %s226_s1 = inlined_call_operand.vmem [shape: f32[1,128], index: 1, kind: input, shape index: {}]   ;;  %s227_s2 = inlined_call_operand.vmem [shape: f32[1,128], index: 2, kind: input, shape index: {}]   ;;  %s228_s3 = inlined_call_operand.hbm [shape: f32[16,128], index: 3, kind: input, shape index: {}]   ;;  %s229_s4 = inlined_call_operand.hbm [shape: f32[16,128], index: 4, kind: output, shape index: {}]  }
   0x1   :  { %11 = vsyncpa [#allocation6], 0  ;;  %s20_s17 = sshll.u32 %s228_s3, 4  ;;  %s175_s18 = smov [#allocation4]   ;;  %s21_s17 = int_to_ptr.hbm [resolvable:$true] %s20_s17 }
   0x2   :  { %s22_s19 = sshll.u32 %s175_s18, 4  ;;  %s176_s20 = smov 128   ;;  %s23_s19 = int_to_ptr.vmem [resolvable:$true] %s22_s19 }
   0x3   :  { %s177_s21 = smov 8  }
   0x4   :  { %28 = dma.hbm_to_vmem [thread:$0]  %s21_s17, 256, %s23_s19, [#allocation5], %s176_s20, %s176_s20, %s177_s21  }
   0x5   :  { %171 = dma.done.wait [#allocation5], 256  }
   0x6   :  { %172 = vsyncadd [#allocation5], 4294967040  ;;  %v35_v0 = vld [vmem:[#allocation4] sm:$0xff]  ;;  %v36_v3 = vld [vmem:[#allocation4 + $0x8] sm:$0xff]  ;;  %v48_v5 = vstv %s225_s0  ;;  %s178_s0 = smov [#allocation7]   ;;  %s92_s28 = sshll.u32 %s229_s4, 4  ;;  %s93_s28 = int_to_ptr.hbm [resolvable:$true] %s92_s28 }
   0x7   :  { %v109_v1 = vld [vmem:[%s227_s2] ss:$0 sm:$0xff] }
   0x8   :  { %v40_v2 = vsub.f32 %v109_v1, %v35_v0  ;;  %v41_v4 = vsub.f32 %v109_v1, %v36_v3  ;;  %v110_v12 = vld [vmem:[%s226_s1] ss:$0 sm:$0xff]  ;;  %s90_s1 = sshll.u32 %s178_s0, 4  ;;  %s91_s1 = int_to_ptr.vmem [resolvable:$true] %s90_s1 }
   0xa   :  { %42 = vmax.xlane.f32.xlu0 %v40_v2 }
  0x12   :  { %44 = vmax.xlane.f32.xlu0 %v41_v4 }
  0x7d   :  { %v43_v6 = vpop.xlane.xlu0 %42 }
  0x7e   :  { %v46_v7 = vsub.f32 %v40_v2, %v43_v6 }
  0x80   :  { %v49_v8 = vmul.f32 %v48_v5, %v46_v7 }
  0x82   :  { %v51_v9 = vmul.f32 1.442695, %v49_v8 }
  0x84   :  { %111 = vpow2.f32 %v51_v9 }
  0x85   :  { %v45_v10 = vpop.xlane.xlu0 %44 }
  0x86   :  { %v47_v11 = vsub.f32 %v41_v4, %v45_v10 }
  0x88   :  { %v50_v13 = vmul.f32 %v48_v5, %v47_v11 }
  0x8a   :  { %v112_v14 = vpop.eup %111  ;;  %v53_v15 = vmul.f32 1.442695, %v50_v13 }
  0x8b   :  { %v59_v16 = vmul.f32 %v112_v14, %v110_v12 }
  0x8c   :  { %113 = vpow2.f32 %v53_v15 }
  0x8d   :  { %61 = vadd.xlane.f32.xlu1 %v59_v16 }
  0x92   :  { %v114_v17 = vpop.eup %113 }
  0x93   :  { %v60_v18 = vmul.f32 %v114_v17, %v110_v12 }
  0x95   :  { %63 = vadd.xlane.f32.xlu1 %v60_v18 }
 0x100   :  { %v62_v19 = vpop.xlane.xlu1 %61 }
 0x101   :  { %115 = vlog2.f32 %v62_v19 }
 0x107   :  { %v116_v21 = vpop.eup %115 }
 0x108   :  { %v64_v20 = vpop.xlane.xlu1 %63  ;;  %v66_v22 = vmul.f32 0.6931472, %v116_v21 }
 0x109   :  { %117 = vlog2.f32 %v64_v20 }
 0x10a   :  { %v69_v25 = vsub.f32 %v49_v8, %v66_v22 }
 0x10f   :  { %v118_v23 = vpop.eup %117 }
 0x110   :  { %v68_v24 = vmul.f32 0.6931472, %v118_v23 }
 0x112   :  { %v70_v26 = vsub.f32 %v50_v13, %v68_v24 }
 0x114   :  { %v71_v27 = vmax.f32 %v69_v25, %v70_v26 }
 0x116   :  { %v72_v28 = vrot.slane %v71_v27, 4 }
 0x118   :  { %v73_v29 = vmax.f32 %v71_v27, %v72_v28 }
 0x11a   :  { %v74_v30 = vrot.slane %v73_v29, 2 }
 0x11c   :  { %v75_v31 = vmax.f32 %v73_v29, %v74_v30 }
 0x11e   :  { %v76_v32 = vrot.slane %v75_v31, 1 }
 0x120   :  { %v77_v33 = vmax.f32 %v75_v31, %v76_v32 }
 0x122   :  { %v78_v34 = vsub.f32 %v69_v25, %v77_v33  ;;  %v79_v35 = vsub.f32 %v70_v26, %v77_v33 }
 0x124   :  { %v80_v36 = vmul.f32 1.442695, %v78_v34  ;;  %v82_v37 = vmul.f32 1.442695, %v79_v35 }
 0x126   :  { %119 = vpow2.f32 %v80_v36 }
 0x127   :  { %121 = vpow2.f32 %v82_v37 }
 0x12c   :  { %v120_v38 = vpop.eup %119 }
 0x12d   :  { %v122_v39 = vpop.eup %121  ;;  %84 = vst [vmem:[#allocation7] sm:$0xff] %v120_v38 }
 0x12e   :  { %85 = vst [vmem:[#allocation7 + $0x8] sm:$0xff] %v122_v39 }
 0x12f   :  { %98 = dma.vmem_to_hbm [thread:$0]  %s91_s1, 256, %s93_s28, [#allocation6], %s176_s20, %s176_s20, %s177_s21  }
 0x130   :  { %173 = dma.done.wait [#allocation6], 256  }
 0x131   :  { %174 = vsyncadd [#allocation6], 4294967040 }
 0x132   :  { %103 = vsyncpa [#allocation5], 1 }
 0x133   :  { %104 = vsyncpa [#allocation6], 1 }

</bundles_post_ra>
